<compile_context>
chip_gen: v6e
topology: v6e:2x2x1
jax: 0.10.0
libtpu: 0.0.40
codegen_flags: <defaults>
</compile_context>

<pallas_src>
import functools

import jax
import jax.numpy as jnp
from jax.experimental import pallas as pl
from jax.experimental.pallas import tpu as pltpu

LANES = 128              # lane width (last dim of every block)
MAX_BLOCK_ROWS = 4096    # 4096 x 128 f32 = 2 MiB per input block (2 inputs x 2 bufs = 8 MiB live)


def _sublane_multiple(dtype):
    # sublane tiling requirement by itemsize: f32 -> 8, bf16 -> 16, int8/fp8 -> 32
    return {4: 8, 2: 16, 1: 32}.get(jnp.dtype(dtype).itemsize, 8)


def _dual_tensorcore():
    """True on chips where a 'parallel' grid axis is sharded across 2 TensorCores
    (v4 / v5p megacore, v7x); False on single-TC-per-device v2/v3, v5e, v6e."""
    try:
        kind = jax.devices()[0].device_kind.lower()
    except Exception:
        return False
    if "lite" in kind or "v5e" in kind or "v6e" in kind:
        return False
    return any(tag in kind for tag in ("v4", "v5p", "v5", "v7", "tpu7", "7x"))


def _focal_elems(x, t, alpha, gamma):
    """Per-element focal loss in plain JAX (used only for the <128-element tail)."""
    x = x.astype(jnp.float32)
    t = t.astype(jnp.float32)
    bce = jnp.maximum(x, 0.0) - x * t + jnp.log1p(jnp.exp(-jnp.abs(x)))
    at = jnp.float32(alpha) + t * jnp.float32(1.0 - 2.0 * alpha)
    pt = jnp.exp(-bce)
    return at * (1.0 - pt) ** jnp.float32(gamma) * bce


def _focal_loss_kernel(x_ref, t_ref, out_ref, *, steps, block_elems,
                       first_masked, rel_valid, alpha, gamma):
    c = pl.program_id(0)   # chunk axis ("parallel": split across TCs on dual-TC chips)
    s = pl.program_id(1)   # sequential reduction axis within a chunk

    @pl.when(s == 0)
    def _():
        out_ref[...] = jnp.zeros_like(out_ref)

    x = x_ref[...]
    t = t_ref[...]
    if x.dtype != jnp.float32:
        x = x.astype(jnp.float32)
    if t.dtype != jnp.float32:
        t = t.astype(jnp.float32)

    # numerically stable binary_cross_entropy_with_logits, reduction='none'
    e = jnp.exp(-jnp.abs(x))                              # EUP exp (reused below)
    bce = jnp.maximum(x, 0.0) - x * t + jnp.log1p(e)      # EUP log1p
    # pt = exp(-bce). For binary {0,1} targets (required by the alpha gather in the
    # reference) this equals sigmoid(x) if t==1 else 1-sigmoid(x); reuse e so no
    # second exp is pushed through the single EUP slot.
    sig = pl.reciprocal(1.0 + e, approx=False)            # sigmoid(|x|), exact
    pt = jnp.where((t >= 0.5) == (x >= 0.0), sig, e * sig)

    q = jnp.maximum(1.0 - pt, 0.0)        # clamp: pt can round slightly above 1
    if float(gamma) == 2.0:
        mod = q * q                       # explicit square -> no pow on the EUP
    else:
        mod = q ** jnp.float32(gamma)
    # at = [alpha, 1-alpha].gather(0, t.long()) == alpha + t*(1-2*alpha) for t in {0,1}
    at = jnp.float32(alpha) + t * jnp.float32(1.0 - 2.0 * alpha)
    f = at * mod * bce

    def _accumulate(vals):
        # (block_rows, 128) -> (1, 128): VPU vreg adds + one small sublane reduce.
        out_ref[...] += jnp.sum(vals, axis=0, keepdims=True)

    if first_masked is None:
        _accumulate(f)                    # every block is fully valid
    else:
        gb = c * steps + s                # logical global block index

        @pl.when(gb < first_masked)       # interior blocks: unmasked fast path
        def _():
            _accumulate(f)

        @pl.when(gb >= first_masked)      # ragged last block / clamped overshoot block
        def _():
            row = jax.lax.broadcasted_iota(jnp.int32, f.shape, 0)
            col = jax.lax.broadcasted_iota(jnp.int32, f.shape, 1)
            rel = (gb - first_masked) * block_elems + row * LANES + col
            _accumulate(jnp.where(rel < rel_valid, f, 0.0))


def weighted_focal_loss(inputs, targets, alpha=0.25, gamma=2.0,
                        max_block_rows=MAX_BLOCK_ROWS, num_chunks=None):
    assert inputs.shape == targets.shape, (
        f"WeightedFocalLoss: Shape mismatch inputs: {inputs.shape}, "
        f"targets: {targets.shape}")

    x = inputs.reshape(-1)
    t = targets.reshape(-1)
    n = x.shape[0]
    n_main = (n // LANES) * LANES        # lane-aligned prefix handled by the kernel
    tail = n - n_main

    total = jnp.float32(0.0)
    if tail:
        # <=127-element tail in plain JAX: avoids the full-array pad copy (~3x HBM
        # traffic on ragged inputs) paid by the previous revision.
        total = total + jnp.sum(_focal_elems(x[n_main:], t[n_main:], alpha, gamma))
    if n_main == 0:
        return (total / jnp.float32(n)).astype(jnp.float32)

    xm = (x if tail == 0 else x[:n_main]).reshape(n_main // LANES, LANES)
    tm = (t if tail == 0 else t[:n_main]).reshape(n_main // LANES, LANES)
    rows = n_main // LANES

    # Block size: as large as possible (amortizes ~0.35us/grid-step overhead),
    # rounded to the sublane multiple required by the input dtypes.
    sub = max(_sublane_multiple(xm.dtype), _sublane_multiple(tm.dtype))
    if rows <= max_block_rows:
        block_rows = rows                # full-extent block (always tiling-legal)
    else:
        block_rows = max(sub, (max_block_rows // sub) * sub)
    num_blocks = pl.cdiv(rows, block_rows)

    # Chunk ('parallel') axis: split only on dual-TensorCore chips; on single-TC
    # v5e/v6e a second chunk just adds a wasted fully-masked overshoot block.
    if num_chunks is None:
        num_chunks = 2 if _dual_tensorcore() else 1
    num_chunks = max(1, min(int(num_chunks), num_blocks))
    steps = pl.cdiv(num_blocks, num_chunks)
    total_blocks = num_chunks * steps    # may overshoot num_blocks by <= num_chunks-1

    block_elems = block_rows * LANES
    first_masked = n_main // block_elems   # first block containing any invalid elem
    if first_masked >= total_blocks:
        first_masked = None                # every block fully valid
        rel_valid = 0
    else:
        rel_valid = n_main - first_masked * block_elems

    kernel = functools.partial(
        _focal_loss_kernel, steps=steps, block_elems=block_elems,
        first_masked=first_masked, rel_valid=rel_valid,
        alpha=float(alpha), gamma=float(gamma))

    last_block = num_blocks - 1

    def in_map(c, s):
        # Clamp overshoot blocks onto the last real block; their contribution is
        # fully masked out inside the kernel before accumulation.
        return (jnp.minimum(c * steps + s, last_block), 0)

    # Explicit scoped-VMEM budget: 2 pipeline buffers x 2 inputs x block bytes plus
    # headroom, so v5e's 16 MiB scoped default doesn't force smaller tiles.
    per_block_bytes = block_rows * LANES * (
        jnp.dtype(xm.dtype).itemsize + jnp.dtype(tm.dtype).itemsize)
    vmem_limit = int(min(128 * 2**20, max(32 * 2**20, 2 * per_block_bytes + 16 * 2**20)))

    partials = pl.pallas_call(
        kernel,
        out_shape=jax.ShapeDtypeStruct((num_chunks, LANES), jnp.float32),
        grid=(num_chunks, steps),
        in_specs=[
            pl.BlockSpec((block_rows, LANES), in_map),
            pl.BlockSpec((block_rows, LANES), in_map),
        ],
        out_specs=pl.BlockSpec((1, LANES), lambda c, s: (c, 0)),
        compiler_params=pltpu.CompilerParams(
            dimension_semantics=("parallel", "arbitrary"),
            vmem_limit_bytes=vmem_limit),
    )(xm, tm)

    total = total + jnp.sum(partials)
    return (total / jnp.float32(n)).astype(jnp.float32)


def _reference(inputs, targets, alpha=0.25, gamma=2.0):
    x = inputs.reshape(-1).astype(jnp.float32)
    t = targets.reshape(-1).astype(jnp.float32)
    bce = jnp.maximum(x, 0.0) - x * t + jnp.log1p(jnp.exp(-jnp.abs(x)))
    at = jnp.where(t.astype(jnp.int32) == 0, alpha, 1.0 - alpha)
    pt = jnp.exp(-bce)
    return jnp.mean(at * (1.0 - pt) ** gamma * bce)


if __name__ == "__main__":
    key = jax.random.PRNGKey(0)
    k1, k2, k3, k4, k5, k6, k7, k8 = jax.random.split(key, 8)

    # Primary example: logits + binary targets on an NCHW-like activation map.
    inputs = jax.random.normal(k1, (2, 4, 16, 16), dtype=jnp.float32)
    targets = jax.random.bernoulli(k2, p=0.3, shape=(2, 4, 16, 16)).astype(jnp.float32)
    loss = jax.block_until_ready(jax.jit(weighted_focal_loss)(inputs, targets))
    ref = _reference(inputs, targets)
    assert jnp.allclose(loss, ref, rtol=1e-5, atol=1e-6), (loss, ref)

    # Ragged size (n % 128 != 0): lane-aligned prefix in the kernel, tail in JAX.
    xi = jax.random.normal(k3, (2, 3, 7, 9), dtype=jnp.float32)
    ti = jax.random.bernoulli(k4, p=0.5, shape=(2, 3, 7, 9)).astype(jnp.float32)
    l2 = jax.block_until_ready(weighted_focal_loss(xi, ti))
    r2 = _reference(xi, ti)
    assert jnp.allclose(l2, r2, rtol=1e-5, atol=1e-6), (l2, r2)

    # Multi-block / multi-chunk path (forced 2 chunks: ragged last block + clamped
    # fully-masked overshoot block), exercised at small size via max_block_rows.
    xb = jax.random.normal(k5, (10, 512), dtype=jnp.float32)
    tb = jax.random.bernoulli(k6, p=0.3, shape=(10, 512)).astype(jnp.float32)
    l3 = jax.block_until_ready(
        weighted_focal_loss(xb, tb, max_block_rows=16, num_chunks=2))
    r3 = _reference(xb, tb)
    assert jnp.allclose(l3, r3, rtol=1e-5, atol=1e-6), (l3, r3)

    # bf16 pass-through (halved read traffic), block rows rounded to the 16-sublane
    # multiple required by bf16 tiling.
    xh = jax.random.normal(k7, (48, 128), dtype=jnp.bfloat16)
    th = jax.random.bernoulli(k8, p=0.4, shape=(48, 128)).astype(jnp.bfloat16)
    l4 = jax.block_until_ready(weighted_focal_loss(xh, th, max_block_rows=20))
    r4 = _reference(xh, th)
    assert jnp.allclose(l4, r4, rtol=1e-5, atol=1e-6), (l4, r4)

    print("KERNEL_OK")
</pallas_src>

<mosaic_0001>
module attributes {stable_mosaic.version = 11 : i64} {
  func.func @_focal_loss_kernel(%arg0: i32, %arg1: i32, %arg2: memref<16x128xf32, #tpu.memory_space<vmem>>, %arg3: memref<16x128xf32, #tpu.memory_space<vmem>>, %arg4: memref<1x128xf32, #tpu.memory_space<vmem>>) attributes {dimension_semantics = [#tpu.dimension_semantics<parallel>, #tpu.dimension_semantics<arbitrary>], iteration_bounds = array<i64: 1, 1>, scalar_prefetch = 0 : i64, scratch_operands = 0 : i64, tpu.core_type = #tpu.core_type<tc>, window_params = [{transform_indices = @transform_0, window_bounds = array<i64: 16, 128>}, {transform_indices = @transform_1, window_bounds = array<i64: 16, 128>}, {transform_indices = @transform_2, window_bounds = array<i64: 1, 128>}]} {
    %c0_i32 = arith.constant 0 : i32
    %0 = arith.cmpi eq, %arg1, %c0_i32 : i32
    %1 = arith.extui %0 : i1 to i32
    %c0_i32_0 = arith.constant 0 : i32
    %2 = arith.cmpi ne, %1, %c0_i32_0 : i32
    scf.if %2 {
      %cst_18 = arith.constant 0.000000e+00 : f32
      %42 = vector.broadcast %cst_18 : f32 to vector<1x128xf32>
      %c0_19 = arith.constant 0 : index
      %c0_20 = arith.constant 0 : index
      %43 = vector.load %arg4[%c0_19, %c0_20] : memref<1x128xf32, #tpu.memory_space<vmem>>, vector<1x128xf32>
      tpu.vector_store %arg4[%c0_19, %c0_20], %42 {strides = array<i32>} : memref<1x128xf32, #tpu.memory_space<vmem>>, vector<1x128xf32>,
    } else {
    }
    %c0 = arith.constant 0 : index
    %c0_1 = arith.constant 0 : index
    %3 = vector.load %arg2[%c0, %c0_1] : memref<16x128xf32, #tpu.memory_space<vmem>>, vector<16x128xf32>
    %c0_2 = arith.constant 0 : index
    %c0_3 = arith.constant 0 : index
    %4 = vector.load %arg3[%c0_2, %c0_3] : memref<16x128xf32, #tpu.memory_space<vmem>>, vector<16x128xf32>
    %5 = math.absf %3 : vector<16x128xf32>
    %cst = arith.constant 0.000000e+00 : f32
    %6 = vector.broadcast %cst : f32 to vector<16x128xf32>
    %7 = arith.subf %6, %5 : vector<16x128xf32>
    %8 = math.exp %7 : vector<16x128xf32>
    %cst_4 = arith.constant 0.000000e+00 : f32
    %9 = vector.broadcast %cst_4 : f32 to vector<16x128xf32>
    %10 = arith.maximumf %3, %9 : vector<16x128xf32>
    %11 = arith.mulf %3, %4 : vector<16x128xf32>
    %12 = arith.subf %10, %11 : vector<16x128xf32>
    %13 = math.log1p %8 : vector<16x128xf32>
    %14 = arith.addf %12, %13 : vector<16x128xf32>
    %cst_5 = arith.constant 1.000000e+00 : f32
    %15 = vector.broadcast %cst_5 : f32 to vector<16x128xf32>
    %16 = arith.addf %15, %8 : vector<16x128xf32>
    %17 = tpu.reciprocal %16 : vector<16x128xf32> -> vector<16x128xf32>
    %cst_6 = arith.constant 5.000000e-01 : f32
    %18 = vector.broadcast %cst_6 : f32 to vector<16x128xf32>
    %19 = arith.cmpf oge, %4, %18 : vector<16x128xf32>
    %cst_7 = arith.constant 0.000000e+00 : f32
    %20 = vector.broadcast %cst_7 : f32 to vector<16x128xf32>
    %21 = arith.cmpf oge, %3, %20 : vector<16x128xf32>
    %22 = arith.xori %19, %21 : vector<16x128xi1>
    %cst_8 = arith.constant dense<true> : vector<16x128xi1>
    %23 = arith.xori %22, %cst_8 : vector<16x128xi1>
    %24 = arith.mulf %8, %17 : vector<16x128xf32>
    %25 = arith.select %23, %17, %24 : vector<16x128xi1>, vector<16x128xf32>
    %cst_9 = arith.constant 1.000000e+00 : f32
    %26 = vector.broadcast %cst_9 : f32 to vector<16x128xf32>
    %27 = arith.subf %26, %25 : vector<16x128xf32>
    %cst_10 = arith.constant 0.000000e+00 : f32
    %28 = vector.broadcast %cst_10 : f32 to vector<16x128xf32>
    %29 = arith.maximumf %27, %28 : vector<16x128xf32>
    %30 = arith.mulf %29, %29 : vector<16x128xf32>
    %cst_11 = arith.constant 5.000000e-01 : f32
    %31 = vector.broadcast %cst_11 : f32 to vector<16x128xf32>
    %32 = arith.mulf %4, %31 : vector<16x128xf32>
    %cst_12 = arith.constant 2.500000e-01 : f32
    %33 = vector.broadcast %cst_12 : f32 to vector<16x128xf32>
    %34 = arith.addf %33, %32 : vector<16x128xf32>
    %35 = arith.mulf %34, %30 : vector<16x128xf32>
    %36 = arith.mulf %35, %14 : vector<16x128xf32>
    %c0_13 = arith.constant 0 : index
    %c0_14 = arith.constant 0 : index
    %37 = vector.load %arg4[%c0_13, %c0_14] : memref<1x128xf32, #tpu.memory_space<vmem>>, vector<1x128xf32>
    %cst_15 = arith.constant dense<0.000000e+00> : vector<128xf32>
    %38 = vector.multi_reduction <add>, %36, %cst_15 [0] : vector<16x128xf32> to vector<128xf32>
    %39 = vector.shape_cast %38 : vector<128xf32> to vector<1x128xf32>
    %40 = arith.addf %37, %39 : vector<1x128xf32>
    %c0_16 = arith.constant 0 : index
    %c0_17 = arith.constant 0 : index
    %41 = vector.load %arg4[%c0_16, %c0_17] : memref<1x128xf32, #tpu.memory_space<vmem>>, vector<1x128xf32>
    tpu.vector_store %arg4[%c0_16, %c0_17], %40 {strides = array<i32>} : memref<1x128xf32, #tpu.memory_space<vmem>>, vector<1x128xf32>,
    return
  }
  func.func @transform_0(%arg0: i32, %arg1: i32) -> (i32, i32) {
    %c1_i32 = arith.constant 1 : i32
    %0 = arith.muli %arg0, %c1_i32 : i32
    %1 = arith.addi %0, %arg1 : i32
    %c0_i32 = arith.constant 0 : i32
    %2 = arith.minsi %1, %c0_i32 : i32
    %c0_i32_0 = arith.constant 0 : i32
    %c0_i32_1 = arith.constant 0 : i32
    return %2, %c0_i32_0 : i32, i32
  }
  func.func @transform_1(%arg0: i32, %arg1: i32) -> (i32, i32) {
    %c1_i32 = arith.constant 1 : i32
    %0 = arith.muli %arg0, %c1_i32 : i32
    %1 = arith.addi %0, %arg1 : i32
    %c0_i32 = arith.constant 0 : i32
    %2 = arith.minsi %1, %c0_i32 : i32
    %c0_i32_0 = arith.constant 0 : i32
    %c0_i32_1 = arith.constant 0 : i32
    return %2, %c0_i32_0 : i32, i32
  }
  func.func @transform_2(%arg0: i32, %arg1: i32) -> (i32, i32) {
    %c0_i32 = arith.constant 0 : i32
    %c0_i32_0 = arith.constant 0 : i32
    return %arg0, %c0_i32 : i32, i32
  }
}

</mosaic_0001>

<bundles_post_ra>
// kernel: weighted_focal_loss.1
= control target key start
LH: loop header
LB: loop body
LE: loop exit
PB: predicated region body
PF: predicated region fallthrough
CT: control target
= control target key end

     0   :  { %v188_v0 = vmov 0.0   ;;  %vm189_vm6 = vmmov 1   ;;  %s244_s2 = inlined_call_operand.vmem [shape: f32[1,128], index: 2, kind: output, shape index: {}]   ;;  %s245_s0 = inlined_call_operand.vmem [shape: f32[16,128], index: 0, kind: input, shape index: {}]   ;;  %s246_s1 = inlined_call_operand.vmem [shape: f32[16,128], index: 1, kind: input, shape index: {}]  }
   0x1   :  { %79 = vst [vmem:[%s244_s2] sm:$0x1] %v188_v0  ;;  %v80_v1 = vld [vmem:[%s245_s0] sm:$0xff]  ;;  %v81_v2 = vld [vmem:[%s245_s0 + $0x8] sm:$0xff] }
   0x2   :  { %v84_v3 = vand.u32 2147483647, %v80_v1  ;;  %v85_v4 = vand.u32 2147483647, %v81_v2  ;;  %v82_v13 = vld [vmem:[%s246_s1] sm:$0xff]  ;;  %v83_v14 = vld [vmem:[%s246_s1 + $0x8] sm:$0xff] }
   0x3   :  { %vm122_vm0 = vcmp.ge.f32.partialorder %v82_v13, 0.5  ;;  %vm124_vm1 = vcmp.ge.f32.partialorder %v80_v1, 0.0  ;;  %vm123_vm2 = vcmp.ge.f32.partialorder %v83_v14, 0.5  ;;  %vm125_vm3 = vcmp.ge.f32.partialorder %v81_v2, 0.0 }
   0x4   :  { %v86_v5 = vsub.f32 0.0, %v84_v3  ;;  %v87_v6 = vsub.f32 0.0, %v85_v4  ;;  %vm126_vm4 = vmxor %vm122_vm0, %vm124_vm1  ;;  %v92_v24 = vmax.f32 %v80_v1, 0.0  ;;  %v93_v25 = vmax.f32 %v81_v2, 0.0 }
   0x5   :  { %vm127_vm5 = vmxor %vm123_vm2, %vm125_vm3  ;;  %v94_v26 = vmul.f32 %v82_v13, %v80_v1  ;;  %v95_v27 = vmul.f32 %v83_v14, %v81_v2  ;;  %v140_v33 = vmul.f32 0.5, %v82_v13  ;;  %v141_v40 = vmul.f32 0.5, %v83_v14 }
   0x6   :  { %v88_v7 = vmul.f32 1.442695, %v86_v5  ;;  %v90_v8 = vmul.f32 1.442695, %v87_v6  ;;  %vm220_vm7 = vmxor %vm126_vm4, %vm189_vm6 }
   0x7   :  { %vm129_vm8 = vmxor %vm127_vm5, %vm189_vm6  ;;  %v96_v41 = vsub.f32 %v92_v24, %v94_v26  ;;  %v97_v44 = vsub.f32 %v93_v25, %v95_v27  ;;  %v142_v49 = vadd.f32 0.25, %v140_v33  ;;  %v143_v51 = vadd.f32 0.25, %v141_v40 }
   0x8   :  { %176 = vpow2.f32 %v88_v7  ;;  %v148_v2 = vld [vmem:[%s244_s2] sm:$0x1] }
   0x9   :  { %178 = vpow2.f32 %v90_v8 }
  0x15   :  { %v177_v9 = vpop.eup %176 }
  0x16   :  { %v179_v10 = vpop.eup %178  ;;  %v98_v11 = vadd.f32 1.0, %v177_v9  ;;  %v101_v15 = vmul.f32 -0.5, %v177_v9  ;;  %v104_v19 = vand.u32 2147483647, %v177_v9 }
  0x17   :  { %v107_v12 = vadd.f32 1.0, %v179_v10  ;;  %v110_v16 = vmul.f32 -0.5, %v179_v10  ;;  %v113_v22 = vand.u32 2147483647, %v179_v10 }
  0x18   :  { %180 = vlog2.f32 %v98_v11  ;;  %v102_v17 = vadd.f32 1.0, %v101_v15  ;;  %vm224_vm9 = vcmp.lt.f32.partialorder %v104_v19, 0.0004427343 }
  0x19   :  { %182 = vlog2.f32 %v107_v12  ;;  %v111_v20 = vadd.f32 1.0, %v110_v16  ;;  %vm228_vm10 = vcmp.lt.f32.partialorder %v113_v22, 0.0004427343 }
  0x1a   :  { %184 = vrcp.f32 %v98_v11  ;;  %v103_v31 = vmul.f32 %v177_v9, %v102_v17 }
  0x1b   :  { %186 = vrcp.f32 %v107_v12  ;;  %v112_v36 = vmul.f32 %v179_v10, %v111_v20 }
  0x25   :  { %v181_v18 = vpop.eup %180 }
  0x26   :  { %v183_v21 = vpop.eup %182  ;;  %v100_v30 = vmul.f32 0.6931472, %v181_v18 }
  0x27   :  { %v185_v23 = vpop.eup %184  ;;  %v109_v35 = vmul.f32 0.6931472, %v183_v21 }
  0x28   :  { %v187_v29 = vpop.eup %186  ;;  %v130_v32 = vmul.f32 %v185_v23, %v177_v9  ;;  %v106_v45 = vsel %vm224_vm9, %v103_v31, %v100_v30 }
  0x29   :  { %v131_v37 = vmul.f32 %v187_v29, %v179_v10  ;;  %v115_v47 = vsel %vm228_vm10, %v112_v36, %v109_v35  ;;  %v116_v52 = vadd.f32 %v106_v45, %v96_v41 }
  0x2a   :  { %v132_v39 = vsel %vm220_vm7, %v185_v23, %v130_v32  ;;  %v117_v54 = vadd.f32 %v115_v47, %v97_v44 }
  0x2b   :  { %v133_v42 = vsel %vm129_vm8, %v187_v29, %v131_v37  ;;  %v134_v43 = vsub.f32 1.0, %v132_v39 }
  0x2c   :  { %v135_v46 = vsub.f32 1.0, %v133_v42 }
  0x2d   :  { %v136_v48 = vmax.f32 %v134_v43, 0.0 }
  0x2e   :  { %v137_v50 = vmax.f32 %v135_v46, 0.0 }
  0x2f   :  { %v138_v53 = vmul.f32 %v136_v48, %v136_v48 }
  0x30   :  { %v139_v55 = vmul.f32 %v137_v50, %v137_v50 }
  0x31   :  { %v144_v56 = vmul.f32 %v142_v49, %v138_v53 }
  0x32   :  { %v145_v57 = vmul.f32 %v143_v51, %v139_v55 }
  0x33   :  { %v146_v58 = vmul.f32 %v144_v56, %v116_v52 }
  0x34   :  { %v147_v59 = vmul.f32 %v145_v57, %v117_v54 }
  0x36   :  { %v149_v60 = vadd.f32 %v147_v59, %v146_v58 }
  0x38   :  { %v150_v61 = vrot.slane %v149_v60, 4 }
  0x3a   :  { %v151_v62 = vadd.f32 %v150_v61, %v149_v60 }
  0x3c   :  { %v152_v63 = vrot.slane %v151_v62, 2 }
  0x3e   :  { %v153_v0 = vadd.f32 %v152_v63, %v151_v62 }
  0x40   :  { %v154_v1 = vrot.slane %v153_v0, 1 }
  0x42   :  { %v155_v3 = vadd.f32 %v154_v1, %v153_v0 }
  0x44   :  { %v156_v4 = vadd.f32 %v155_v3, %v148_v2 }
  0x46   :  { %157 = vst [vmem:[%s244_s2] sm:$0x1] %v156_v4 }

</bundles_post_ra>
